<compile_context>
chip_gen: v5e
topology: v5e:2x2
jax: 0.10.0
libtpu: 0.0.40
codegen_flags: <defaults>
</compile_context>

<pallas_src>
import jax
import jax.numpy as jnp
from jax.experimental import pallas as pl
from jax.experimental.pallas import tpu as pltpu

D_IN, D_H1, D_H2, D_OUT = 784, 200, 100, 10
# Lane-padded (multiple-of-128) widths used inside the kernel.
H1P, H2P, OUTP = 256, 128, 128
NEG = -1e30  # effectively -inf for masking padded logit columns


def mlp_kernel(x_ref, w1_ref, b1_ref, w2_ref, b2_ref, w3_ref, b3_ref, o_ref):
    # fc1 + relu  (bf16 operands, fp32 accumulation)
    h1 = jnp.dot(x_ref[...], w1_ref[...], preferred_element_type=jnp.float32)
    h1 = jnp.maximum(h1 + b1_ref[...], 0.0)
    # fc2 + relu
    h2 = jnp.dot(h1.astype(jnp.bfloat16), w2_ref[...],
                 preferred_element_type=jnp.float32)
    h2 = jnp.maximum(h2 + b2_ref[...], 0.0)
    # fc3
    logits = jnp.dot(h2.astype(jnp.bfloat16), w3_ref[...],
                     preferred_element_type=jnp.float32)
    logits = logits + b3_ref[...]
    # Mask lane-padding columns (>= D_OUT) so the log_softmax reduction only sees
    # the 10 real logits. exp(NEG - m) underflows to 0, so padded cols contribute 0.
    col = jax.lax.broadcasted_iota(jnp.int32, logits.shape, 1)
    logits = jnp.where(col < D_OUT, logits, NEG)
    # Numerically stable log_softmax along the last dim.
    m = jnp.max(logits, axis=-1, keepdims=True)
    shifted = logits - m
    lse = jnp.log(jnp.sum(jnp.exp(shifted), axis=-1, keepdims=True))
    o_ref[...] = (shifted - lse).astype(o_ref.dtype)


def _pad2(a, rows, cols):
    r, c = a.shape
    return jnp.pad(a, ((0, rows - r), (0, cols - c)))


def sgd_forward(x, w1, b1, w2, b2, w3, b3):
    # Flatten to (-1, 784) like x.view(-1, 784).
    x2 = x.reshape(-1, D_IN).astype(jnp.float32)
    B = x2.shape[0]

    # Batch tile: 256 rows fills the 2x256 MXU on v6e/v7x (and is a multiple of the
    # 128-row v5e MXU). For toy batches just use one tile of the whole (8-aligned) batch.
    TB = 256 if B >= 256 else max(8, ((B + 7) // 8) * 8)
    Bp = pl.cdiv(B, TB) * TB
    x2 = jnp.pad(x2, ((0, Bp - B), (0, 0))).astype(jnp.bfloat16)

    # Weights zero-padded to lane-dense widths, bf16 operands. Zero pad columns/rows
    # contribute nothing (relu(0)=0), so the math is unchanged.
    w1p = _pad2(w1, D_IN, H1P).astype(jnp.bfloat16)
    w2p = _pad2(w2, H1P, H2P).astype(jnp.bfloat16)
    w3p = _pad2(w3, H2P, OUTP).astype(jnp.bfloat16)
    # Biases stay fp32 (added after the fp32-accumulated dot), padded with zeros.
    b1p = jnp.pad(b1, (0, H1P - D_H1)).reshape(1, H1P).astype(jnp.float32)
    b2p = jnp.pad(b2, (0, H2P - D_H2)).reshape(1, H2P).astype(jnp.float32)
    b3p = jnp.pad(b3, (0, OUTP - D_OUT)).reshape(1, OUTP).astype(jnp.float32)

    grid = (Bp // TB,)
    const = lambda i: (0, 0)
    in_specs = [
        pl.BlockSpec((TB, D_IN), lambda i: (i, 0)),   # x: tiled over the batch
        pl.BlockSpec((D_IN, H1P), const),             # weights/biases: VMEM-resident
        pl.BlockSpec((1, H1P), const),
        pl.BlockSpec((H1P, H2P), const),
        pl.BlockSpec((1, H2P), const),
        pl.BlockSpec((H2P, OUTP), const),
        pl.BlockSpec((1, OUTP), const),
    ]
    out_spec = pl.BlockSpec((TB, OUTP), lambda i: (i, 0))  # lane-dense (128-wide) output

    flops = 2 * B * (D_IN * D_H1 + D_H1 * D_H2 + D_H2 * D_OUT)
    bytes_accessed = (
        x2.size * 2                                   # bf16 activations
        + (w1p.size + w2p.size + w3p.size) * 2        # bf16 weights
        + (b1p.size + b2p.size + b3p.size) * 4        # fp32 biases
        + Bp * OUTP * 4                               # fp32 output
    )
    cost = pl.CostEstimate(flops=flops, transcendentals=B * D_OUT,
                           bytes_accessed=bytes_accessed)

    out = pl.pallas_call(
        mlp_kernel,
        out_shape=jax.ShapeDtypeStruct((Bp, OUTP), jnp.float32),
        grid=grid,
        in_specs=in_specs,
        out_specs=out_spec,
        compiler_params=pltpu.CompilerParams(
            dimension_semantics=("parallel",),        # megacore sharding on v7x
            vmem_limit_bytes=32 * 1024 * 1024,        # safe on v5e/v6e/v7x; tiles are small
        ),
        cost_estimate=cost,
    )(x2, w1p, b1p, w2p, b2p, w3p, b3p)

    # Strip batch padding and the lane padding of the output.
    return out[:B, :D_OUT]


def init_params(key):
    """Deterministic init mimicking nn.Linear's U(-1/sqrt(fan_in), 1/sqrt(fan_in))."""
    ks = jax.random.split(key, 6)

    def lin(kw, kb, fan_in, fan_out):
        bound = 1.0 / jnp.sqrt(fan_in)
        w = jax.random.uniform(kw, (fan_in, fan_out), jnp.float32, -bound, bound)
        b = jax.random.uniform(kb, (fan_out,), jnp.float32, -bound, bound)
        return w, b

    w1, b1 = lin(ks[0], ks[1], D_IN, D_H1)
    w2, b2 = lin(ks[2], ks[3], D_H1, D_H2)
    w3, b3 = lin(ks[4], ks[5], D_H2, D_OUT)
    return w1, b1, w2, b2, w3, b3


if __name__ == "__main__":
    key = jax.random.PRNGKey(0)
    kx, kp = jax.random.split(key)
    # Small MNIST-like batch: 8 images of 1x28x28 (flattened to 784 inside forward).
    x = jax.random.normal(kx, (8, 1, 28, 28), dtype=jnp.float32)
    params = init_params(kp)

    out = sgd_forward(x, *params)
    out = jax.block_until_ready(out)
    assert out.shape == (8, D_OUT)

    w1, b1, w2, b2, w3, b3 = params
    x2 = x.reshape(-1, D_IN)

    # Reference 1: bf16-matched (same casts as the kernel) -> tight tolerance.
    xb = x2.astype(jnp.bfloat16)
    h1 = jnp.maximum(jnp.dot(xb, w1.astype(jnp.bfloat16),
                             preferred_element_type=jnp.float32) + b1, 0.0)
    h2 = jnp.maximum(jnp.dot(h1.astype(jnp.bfloat16), w2.astype(jnp.bfloat16),
                             preferred_element_type=jnp.float32) + b2, 0.0)
    logits = jnp.dot(h2.astype(jnp.bfloat16), w3.astype(jnp.bfloat16),
                     preferred_element_type=jnp.float32) + b3
    ref_bf16 = jax.nn.log_softmax(logits, axis=-1)
    assert jnp.allclose(out, ref_bf16, atol=1e-3, rtol=1e-3), "mismatch vs bf16 reference"

    # Reference 2: full fp32 math -> loose tolerance (bf16 operand rounding).
    h1f = jnp.maximum(x2 @ w1 + b1, 0.0)
    h2f = jnp.maximum(h1f @ w2 + b2, 0.0)
    ref_f32 = jax.nn.log_softmax(h2f @ w3 + b3, axis=-1)
    assert jnp.allclose(out, ref_f32, atol=0.1, rtol=0.1), "mismatch vs fp32 reference"

    print("KERNEL_OK")
</pallas_src>

<mosaic_0001>
module attributes {stable_mosaic.version = 11 : i64} {
  func.func @mlp_kernel(%arg0: i32, %arg1: memref<8x784xbf16, #tpu.memory_space<vmem>>, %arg2: memref<784x256xbf16, #tpu.memory_space<vmem>>, %arg3: memref<1x256xf32, #tpu.memory_space<vmem>>, %arg4: memref<256x128xbf16, #tpu.memory_space<vmem>>, %arg5: memref<1x128xf32, #tpu.memory_space<vmem>>, %arg6: memref<128x128xbf16, #tpu.memory_space<vmem>>, %arg7: memref<1x128xf32, #tpu.memory_space<vmem>>, %arg8: memref<8x128xf32, #tpu.memory_space<vmem>>) attributes {dimension_semantics = [#tpu.dimension_semantics<parallel>], iteration_bounds = array<i64: 1>, scalar_prefetch = 0 : i64, scratch_operands = 0 : i64, tpu.core_type = #tpu.core_type<tc>, window_params = [{transform_indices = @transform_0, window_bounds = array<i64: 8, 784>}, {pipeline_mode = #tpu.pipeline_mode<synchronous>, transform_indices = @transform_1, window_bounds = array<i64: 784, 256>}, {pipeline_mode = #tpu.pipeline_mode<synchronous>, transform_indices = @transform_2, window_bounds = array<i64: 1, 256>}, {pipeline_mode = #tpu.pipeline_mode<synchronous>, transform_indices = @transform_3, window_bounds = array<i64: 256, 128>}, {pipeline_mode = #tpu.pipeline_mode<synchronous>, transform_indices = @transform_4, window_bounds = array<i64: 1, 128>}, {pipeline_mode = #tpu.pipeline_mode<synchronous>, transform_indices = @transform_5, window_bounds = array<i64: 128, 128>}, {pipeline_mode = #tpu.pipeline_mode<synchronous>, transform_indices = @transform_6, window_bounds = array<i64: 1, 128>}, {transform_indices = @transform_7, window_bounds = array<i64: 8, 128>}]} {
    %c0 = arith.constant 0 : index
    %c0_0 = arith.constant 0 : index
    %0 = vector.load %arg1[%c0, %c0_0] : memref<8x784xbf16, #tpu.memory_space<vmem>>, vector<8x784xbf16>
    %c0_1 = arith.constant 0 : index
    %c0_2 = arith.constant 0 : index
    %1 = vector.load %arg2[%c0_1, %c0_2] : memref<784x256xbf16, #tpu.memory_space<vmem>>, vector<784x256xbf16>
    %cst = arith.constant dense<0.000000e+00> : vector<8x256xf32>
    %2 = tpu.matmul %0, %1, %cst {dimension_numbers = #tpu.dot_dimension_numbers<[1], [0], [0], [1], [0, 0, 1, 1], [], []>} : vector<8x784xbf16>, vector<784x256xbf16>, vector<8x256xf32> -> vector<8x256xf32>
    %c0_3 = arith.constant 0 : index
    %c0_4 = arith.constant 0 : index
    %3 = vector.load %arg3[%c0_3, %c0_4] : memref<1x256xf32, #tpu.memory_space<vmem>>, vector<1x256xf32>
    %4 = vector.broadcast %3 : vector<1x256xf32> to vector<8x256xf32>
    %5 = arith.addf %2, %4 : vector<8x256xf32>
    %cst_5 = arith.constant 0.000000e+00 : f32
    %6 = vector.broadcast %cst_5 : f32 to vector<8x256xf32>
    %7 = arith.maximumf %5, %6 : vector<8x256xf32>
    %8 = arith.truncf %7 : vector<8x256xf32> to vector<8x256xbf16>
    %c0_6 = arith.constant 0 : index
    %c0_7 = arith.constant 0 : index
    %9 = vector.load %arg4[%c0_6, %c0_7] : memref<256x128xbf16, #tpu.memory_space<vmem>>, vector<256x128xbf16>
    %cst_8 = arith.constant dense<0.000000e+00> : vector<8x128xf32>
    %10 = tpu.matmul %8, %9, %cst_8 {dimension_numbers = #tpu.dot_dimension_numbers<[1], [0], [0], [1], [0, 0, 1, 1], [], []>} : vector<8x256xbf16>, vector<256x128xbf16>, vector<8x128xf32> -> vector<8x128xf32>
    %c0_9 = arith.constant 0 : index
    %c0_10 = arith.constant 0 : index
    %11 = vector.load %arg5[%c0_9, %c0_10] : memref<1x128xf32, #tpu.memory_space<vmem>>, vector<1x128xf32>
    %12 = vector.broadcast %11 : vector<1x128xf32> to vector<8x128xf32>
    %13 = arith.addf %10, %12 : vector<8x128xf32>
    %cst_11 = arith.constant 0.000000e+00 : f32
    %14 = vector.broadcast %cst_11 : f32 to vector<8x128xf32>
    %15 = arith.maximumf %13, %14 : vector<8x128xf32>
    %16 = arith.truncf %15 : vector<8x128xf32> to vector<8x128xbf16>
    %c0_12 = arith.constant 0 : index
    %c0_13 = arith.constant 0 : index
    %17 = vector.load %arg6[%c0_12, %c0_13] : memref<128x128xbf16, #tpu.memory_space<vmem>>, vector<128x128xbf16>
    %cst_14 = arith.constant dense<0.000000e+00> : vector<8x128xf32>
    %18 = tpu.matmul %16, %17, %cst_14 {dimension_numbers = #tpu.dot_dimension_numbers<[1], [0], [0], [1], [0, 0, 1, 1], [], []>} : vector<8x128xbf16>, vector<128x128xbf16>, vector<8x128xf32> -> vector<8x128xf32>
    %c0_15 = arith.constant 0 : index
    %c0_16 = arith.constant 0 : index
    %19 = vector.load %arg7[%c0_15, %c0_16] : memref<1x128xf32, #tpu.memory_space<vmem>>, vector<1x128xf32>
    %20 = vector.broadcast %19 : vector<1x128xf32> to vector<8x128xf32>
    %21 = arith.addf %18, %20 : vector<8x128xf32>
    %22 = tpu.iota {dimensions = array<i32: 1>} : vector<8x128xi32>
    %c10_i32 = arith.constant 10 : i32
    %23 = vector.broadcast %c10_i32 : i32 to vector<8x128xi32>
    %24 = arith.cmpi slt, %22, %23 : vector<8x128xi32>
    %cst_17 = arith.constant -1.000000e+30 : f32
    %25 = vector.broadcast %cst_17 : f32 to vector<8x128xf32>
    %26 = arith.select %24, %21, %25 : vector<8x128xi1>, vector<8x128xf32>
    %cst_18 = arith.constant dense<0xFF800000> : vector<8xf32>
    %27 = vector.multi_reduction <maximumf>, %26, %cst_18 [1] : vector<8x128xf32> to vector<8xf32>
    %28 = vector.shape_cast %27 : vector<8xf32> to vector<8x1xf32>
    %29 = vector.broadcast %28 : vector<8x1xf32> to vector<8x128xf32>
    %30 = arith.subf %26, %29 : vector<8x128xf32>
    %31 = math.exp %30 : vector<8x128xf32>
    %cst_19 = arith.constant dense<0.000000e+00> : vector<8xf32>
    %32 = vector.multi_reduction <add>, %31, %cst_19 [1] : vector<8x128xf32> to vector<8xf32>
    %33 = vector.shape_cast %32 : vector<8xf32> to vector<8x1xf32>
    %34 = math.log %33 : vector<8x1xf32>
    %35 = vector.broadcast %34 : vector<8x1xf32> to vector<8x128xf32>
    %36 = arith.subf %30, %35 : vector<8x128xf32>
    %c0_20 = arith.constant 0 : index
    %c0_21 = arith.constant 0 : index
    %37 = vector.load %arg8[%c0_20, %c0_21] : memref<8x128xf32, #tpu.memory_space<vmem>>, vector<8x128xf32>
    tpu.vector_store %arg8[%c0_20, %c0_21], %36 {strides = array<i32>} : memref<8x128xf32, #tpu.memory_space<vmem>>, vector<8x128xf32>,
    return
  }
  func.func @transform_0(%arg0: i32) -> (i32, i32) {
    %c0_i32 = arith.constant 0 : i32
    %c0_i32_0 = arith.constant 0 : i32
    return %arg0, %c0_i32 : i32, i32
  }
  func.func @transform_1(%arg0: i32) -> (i32, i32) {
    %c0_i32 = arith.constant 0 : i32
    %c0_i32_0 = arith.constant 0 : i32
    %c0_i32_1 = arith.constant 0 : i32
    return %c0_i32, %c0_i32_0 : i32, i32
  }
  func.func @transform_2(%arg0: i32) -> (i32, i32) {
    %c0_i32 = arith.constant 0 : i32
    %c0_i32_0 = arith.constant 0 : i32
    %c0_i32_1 = arith.constant 0 : i32
    return %c0_i32, %c0_i32_0 : i32, i32
  }
  func.func @transform_3(%arg0: i32) -> (i32, i32) {
    %c0_i32 = arith.constant 0 : i32
    %c0_i32_0 = arith.constant 0 : i32
    %c0_i32_1 = arith.constant 0 : i32
    return %c0_i32, %c0_i32_0 : i32, i32
  }
  func.func @transform_4(%arg0: i32) -> (i32, i32) {
    %c0_i32 = arith.constant 0 : i32
    %c0_i32_0 = arith.constant 0 : i32
    %c0_i32_1 = arith.constant 0 : i32
    return %c0_i32, %c0_i32_0 : i32, i32
  }
  func.func @transform_5(%arg0: i32) -> (i32, i32) {
    %c0_i32 = arith.constant 0 : i32
    %c0_i32_0 = arith.constant 0 : i32
    %c0_i32_1 = arith.constant 0 : i32
    return %c0_i32, %c0_i32_0 : i32, i32
  }
  func.func @transform_6(%arg0: i32) -> (i32, i32) {
    %c0_i32 = arith.constant 0 : i32
    %c0_i32_0 = arith.constant 0 : i32
    %c0_i32_1 = arith.constant 0 : i32
    return %c0_i32, %c0_i32_0 : i32, i32
  }
  func.func @transform_7(%arg0: i32) -> (i32, i32) {
    %c0_i32 = arith.constant 0 : i32
    %c0_i32_0 = arith.constant 0 : i32
    return %arg0, %c0_i32 : i32, i32
  }
}

</mosaic_0001>

<bundles_post_ra>
// kernel: tpu_custom_call.1
= control target key start
LH: loop header
LB: loop body
LE: loop exit
PB: predicated region body
PF: predicated region fallthrough
CT: control target
= control target key end

     0   :  { %12 = vsyncpa [#allocation3], 0  ;;  %s2073_s0 = inlined_call_operand.hbm [shape: bf16[8,784], index: 0, kind: input, shape index: {}]   ;;  %s2074_s1 = inlined_call_operand.hbm [shape: bf16[784,256], index: 1, kind: input, shape index: {}]   ;;  %s2075_s2 = inlined_call_operand.hbm [shape: f32[1,256], index: 2, kind: input, shape index: {}]   ;;  %s2076_s3 = inlined_call_operand.hbm [shape: bf16[256,128], index: 3, kind: input, shape index: {}]   ;;  %s2077_s4 = inlined_call_operand.vmem [shape: f32[1,128], index: 4, kind: input, shape index: {}]   ;;  %s2078_s5 = inlined_call_operand.hbm [shape: bf16[128,128], index: 5, kind: input, shape index: {}]   ;;  %s2079_s6 = inlined_call_operand.vmem [shape: f32[1,128], index: 6, kind: input, shape index: {}]   ;;  %s2080_s7 = inlined_call_operand.hbm [shape: f32[8,128], index: 7, kind: output, shape index: {}]  }
   0x1   :  { %13 = vsyncpa [#allocation6], 0 }
   0x2   :  { %14 = vsyncpa [#allocation9], 0  ;;  %s31_s26 = sshll.u32 %s2074_s1, 4  ;;  %s32_s26 = int_to_ptr.hbm [resolvable:$true] %s31_s26 }
   0x3   :  { %15 = vsyncpa [#allocation4], 0  ;;  %s1969_s27 = smov [#allocation5]   ;;  %s55_s8 = sshll.u32 %s2076_s3, 4  ;;  %s56_s8 = int_to_ptr.hbm [resolvable:$true] %s55_s8 }
   0x4   :  { %s33_s28 = sshll.u32 %s1969_s27, 4  ;;  %s1970_s9 = smov 128   ;;  %s34_s28 = int_to_ptr.vmem [resolvable:$true] %s33_s28 }
   0x5   :  { %s1971_s10 = smov 8   ;;  %s1972_s11 = smov [#allocation8]  }
   0x6   :  { %39 = dma.hbm_to_vmem [thread:$0]  %s32_s26, 12544, %s34_s28, [#allocation6], %s1970_s9, %s1970_s9, %s1971_s10  }
   0x7   :  { %s57_s12 = sshll.u32 %s1972_s11, 4  ;;  %s1973_s13 = smov 64   ;;  %s58_s12 = int_to_ptr.vmem [resolvable:$true] %s57_s12 }
   0x8   :  { %s1974_s14 = smov 4   ;;  %s21_s16 = sshll.u32 %s2073_s0, 4  ;;  %s22_s16 = int_to_ptr.hbm [resolvable:$true] %s21_s16 }
   0x9   :  { %63 = dma.hbm_to_vmem [thread:$0]  %s56_s8, 2048, %s58_s12, [#allocation9], %s1973_s13, %s1973_s13, %s1974_s14  }
   0xa   :  { %s1975_s17 = smov [#allocation2]   ;;  %s45_s20 = sshll.u32 %s2075_s2, 4  ;;  %s46_s20 = int_to_ptr.hbm [resolvable:$true] %s45_s20 }
   0xb   :  { %s23_s18 = sshll.u32 %s1975_s17, 4  ;;  %s1976_s21 = smov [#allocation7]   ;;  %s24_s18 = int_to_ptr.vmem [resolvable:$true] %s23_s18 }
   0xc   :  { %26 = dma.hbm_to_vmem [thread:$0]  %s22_s16, 448, %s24_s18, [#allocation3]  }
   0xd   :  { %s47_s22 = sshll.u32 %s1976_s21, 4  ;;  %s70_s25 = sshll.u32 %s2078_s5, 4  ;;  %s48_s22 = int_to_ptr.vmem [resolvable:$true] %s47_s22  ;;  %s71_s25 = int_to_ptr.hbm [resolvable:$true] %s70_s25 }
   0xe   :  { %50 = dma.hbm_to_vmem [thread:$0]  %s46_s20, 32, %s48_s22, [#allocation6]  }
   0xf   :  { %s1977_s0 = smov [#allocation10]  }
  0x10   :  { %s72_s26 = sshll.u32 %s1977_s0, 4  ;;  %s73_s26 = int_to_ptr.vmem [resolvable:$true] %s72_s26 }
  0x11   :  { %78 = dma.hbm_to_vmem [thread:$0]  %s71_s25, 1024, %s73_s26, [#allocation9], %s1973_s13, %s1973_s13, %s1974_s14  }
  0x12   :  { %1961 = dma.done.wait [#allocation3], 448  }
  0x13   :  { %1962 = vsyncadd [#allocation3], 4294966848 }
  0x14   :  { %1963 = dma.done.wait [#allocation6], 12576  }
  0x15   :  { %1964 = vsyncadd [#allocation6], 4294954720 }
  0x16   :  { %1965 = dma.done.wait [#allocation9], 3072  }
  0x17   :  { %1966 = vsyncadd [#allocation9], 4294964224  ;;  %v1247_v0 = vld [vmem:[#allocation5 + $0x70] sm:$0xf]  ;;  %v1694_v1 = vld [vmem:[#allocation5 + $0x74] sm:$0xf0] }
  0x18   :  { %v1375_v2 = vld [vmem:[#allocation5 + $0x170] sm:$0xf]  ;;  %v1248_v3 = vor.u32 %v1694_v1, %v1247_v0  ;;  %v1726_v4 = vld [vmem:[#allocation5 + $0x174] sm:$0xf0]  ;;  %v1239_v11 = vld [vmem:[#allocation5 + $0x60] sm:$0xf] }
  0x19   :  { %v1439_v5 = vld [vmem:[#allocation5 + $0x1f0] sm:$0xf]  ;;  %v1742_v6 = vld [vmem:[#allocation5 + $0x1f4] sm:$0xf0]  ;;  %v1376_v7 = vor.u32 %v1726_v4, %v1375_v2  ;;  %v1692_v13 = vld [vmem:[#allocation5 + $0x64] sm:$0xf0] }
  0x1a   :  { %v1440_v8 = vor.u32 %v1742_v6, %v1439_v5  ;;  %v1311_v9 = vld [vmem:[#allocation5 + $0xf0] sm:$0xf]  ;;  %v1710_v10 = vld [vmem:[#allocation5 + $0xf4] sm:$0xf0]  ;;  %728 = vmatpush.bf16.msra.mxu0 %v1248_v3  ;;  %v1367_v14 = vld [vmem:[#allocation5 + $0x160] sm:$0xf]  ;;  %v1240_v16 = vor.u32 %v1692_v13, %v1239_v11 }
  0x1b   :  { %v1312_v12 = vor.u32 %v1710_v10, %v1311_v9  ;;  %v1724_v15 = vld [vmem:[#allocation5 + $0x164] sm:$0xf0]  ;;  %754 = vmatpush.bf16.msra.mxu2 %v1376_v7  ;;  %v1431_v18 = vld [vmem:[#allocation5 + $0x1e0] sm:$0xf]  ;;  %v1231_v23 = vld [vmem:[#allocation5 + $0x50] sm:$0xf] }
  0x1c   :  { %767 = vmatpush.bf16.msra.mxu3 %v1440_v8  ;;  %v1368_v17 = vor.u32 %v1724_v15, %v1367_v14  ;;  %v1740_v19 = vld [vmem:[#allocation5 + $0x1e4] sm:$0xf0]  ;;  %v1303_v20 = vld [vmem:[#allocation5 + $0xe0] sm:$0xf]  ;;  %v1690_v24 = vld [vmem:[#allocation5 + $0x54] sm:$0xf0] }
  0x1d   :  { %741 = vmatpush.bf16.msra.mxu1 %v1312_v12  ;;  %v1432_v21 = vor.u32 %v1740_v19, %v1431_v18  ;;  %v1708_v22 = vld [vmem:[#allocation5 + $0xe4] sm:$0xf0]  ;;  %v1359_v26 = vld [vmem:[#allocation5 + $0x150] sm:$0xf]  ;;  %v1722_v27 = vld [vmem:[#allocation5 + $0x154] sm:$0xf0]  ;;  %v1232_v29 = vor.u32 %v1690_v24, %v1231_v23 }
  0x1e   :  { %v1304_v25 = vor.u32 %v1708_v22, %v1303_v20  ;;  %v1423_v28 = vld [vmem:[#allocation5 + $0x1d0] sm:$0xf]  ;;  %729 = vmatpush.bf16.msra.mxu0 %v1240_v16  ;;  %v1738_v30 = vld [vmem:[#allocation5 + $0x1d4] sm:$0xf0]  ;;  %v1360_v33 = vor.u32 %v1722_v27, %v1359_v26  ;;  %v1223_v35 = vld [vmem:[#allocation5 + $0x40] sm:$0xf] }
  0x1f   :  { %v1295_v31 = vld [vmem:[#allocation5 + $0xd0] sm:$0xf]  ;;  %v1706_v32 = vld [vmem:[#allocation5 + $0xd4] sm:$0xf0]  ;;  %755 = vmatpush.bf16.msra.mxu2 %v1368_v17  ;;  %v1424_v34 = vor.u32 %v1738_v30, %v1423_v28  ;;  %v1688_v36 = vld [vmem:[#allocation5 + $0x44] sm:$0xf0] }
  0x20   :  { %768 = vmatpush.bf16.msra.mxu3 %v1432_v21  ;;  %v1351_v37 = vld [vmem:[#allocation5 + $0x140] sm:$0xf]  ;;  %v1296_v38 = vor.u32 %v1706_v32, %v1295_v31  ;;  %v1720_v39 = vld [vmem:[#allocation5 + $0x144] sm:$0xf0]  ;;  %v1224_v44 = vor.u32 %v1688_v36, %v1223_v35  ;;  %v1215_v47 = vld [vmem:[#allocation5 + $0x30] sm:$0xf] }
  0x21   :  { %742 = vmatpush.bf16.msra.mxu1 %v1304_v25  ;;  %v1415_v40 = vld [vmem:[#allocation5 + $0x1c0] sm:$0xf]  ;;  %v1736_v41 = vld [vmem:[#allocation5 + $0x1c4] sm:$0xf0]  ;;  %v1352_v45 = vor.u32 %v1720_v39, %v1351_v37  ;;  %v1686_v48 = vld [vmem:[#allocation5 + $0x34] sm:$0xf0] }
  0x22   :  { %v1287_v42 = vld [vmem:[#allocation5 + $0xc0] sm:$0xf]  ;;  %v1704_v43 = vld [vmem:[#allocation5 + $0xc4] sm:$0xf0]  ;;  %730 = vmatpush.bf16.msra.mxu0 %v1232_v29  ;;  %v1416_v46 = vor.u32 %v1736_v41, %v1415_v40  ;;  %v1343_v49 = vld [vmem:[#allocation5 + $0x130] sm:$0xf]  ;;  %v1216_v56 = vor.u32 %v1686_v48, %v1215_v47 }
  0x23   :  { %756 = vmatpush.bf16.msra.mxu2 %v1360_v33  ;;  %v1288_v50 = vor.u32 %v1704_v43, %v1287_v42  ;;  %v1718_v51 = vld [vmem:[#allocation5 + $0x134] sm:$0xf0]  ;;  %v1407_v52 = vld [vmem:[#allocation5 + $0x1b0] sm:$0xf]  ;;  %v1207_v59 = vld [vmem:[#allocation5 + $0x20] sm:$0xf] }
  0x24   :  { %769 = vmatpush.bf16.msra.mxu3 %v1424_v34  ;;  %v1734_v53 = vld [vmem:[#allocation5 + $0x1b4] sm:$0xf0]  ;;  %v1279_v54 = vld [vmem:[#allocation5 + $0xb0] sm:$0xf]  ;;  %v1344_v57 = vor.u32 %v1718_v51, %v1343_v49  ;;  %v1684_v60 = vld [vmem:[#allocation5 + $0x24] sm:$0xf0] }
  0x25   :  { %743 = vmatpush.bf16.msra.mxu1 %v1296_v38  ;;  %v1702_v55 = vld [vmem:[#allocation5 + $0xb4] sm:$0xf0]  ;;  %v1408_v58 = vor.u32 %v1734_v53, %v1407_v52  ;;  %v1335_v61 = vld [vmem:[#allocation5 + $0x120] sm:$0xf]  ;;  %v1716_v63 = vld [vmem:[#allocation5 + $0x124] sm:$0xf0]  ;;  %v1208_v4 = vor.u32 %v1684_v60, %v1207_v59 }
  0x26   :  { %731 = vmatpush.bf16.msra.mxu0 %v1224_v44  ;;  %v1280_v62 = vor.u32 %v1702_v55, %v1279_v54  ;;  %v1399_v0 = vld [vmem:[#allocation5 + $0x1a0] sm:$0xf]  ;;  %v1732_v1 = vld [vmem:[#allocation5 + $0x1a4] sm:$0xf0]  ;;  %v1336_v5 = vor.u32 %v1716_v63, %v1335_v61  ;;  %v1199_v7 = vld [vmem:[#allocation5 + $0x10] sm:$0xf] }
  0x27   :  { %757 = vmatpush.bf16.msra.mxu2 %v1352_v45  ;;  %v1271_v2 = vld [vmem:[#allocation5 + $0xa0] sm:$0xf]  ;;  %v1700_v3 = vld [vmem:[#allocation5 + $0xa4] sm:$0xf0]  ;;  %v1400_v6 = vor.u32 %v1732_v1, %v1399_v0  ;;  %v1682_v8 = vld [vmem:[#allocation5 + $0x14] sm:$0xf0] }
  0x28   :  { %770 = vmatpush.bf16.msra.mxu3 %v1416_v46  ;;  %v1327_v9 = vld [vmem:[#allocation5 + $0x110] sm:$0xf]  ;;  %v1272_v10 = vor.u32 %v1700_v3, %v1271_v2  ;;  %v1714_v11 = vld [vmem:[#allocation5 + $0x114] sm:$0xf0]  ;;  %v1191_v16 = vld [vmem:[#allocation5] sm:$0xf]  ;;  %v1200_v17 = vor.u32 %v1682_v8, %v1199_v7 }
  0x29   :  { %744 = vmatpush.bf16.msra.mxu1 %v1288_v50  ;;  %v1391_v12 = vld [vmem:[#allocation5 + $0x190] sm:$0xf]  ;;  %v1730_v13 = vld [vmem:[#allocation5 + $0x194] sm:$0xf0]  ;;  %v1680_v18 = vld [vmem:[#allocation5 + $0x4] sm:$0xf0]  ;;  %v1328_v21 = vor.u32 %v1714_v11, %v1327_v9 }
  0x2a   :  { %732 = vmatpush.bf16.msra.mxu0 %v1216_v56  ;;  %v1263_v14 = vld [vmem:[#allocation5 + $0x90] sm:$0xf]  ;;  %v1698_v15 = vld [vmem:[#allocation5 + $0x94] sm:$0xf0]  ;;  %v1319_v19 = vld [vmem:[#allocation5 + $0x100] sm:$0xf]  ;;  %v1392_v22 = vor.u32 %v1730_v13, %v1391_v12  ;;  %v1192_v33 = vor.u32 %v1680_v18, %v1191_v16 }
  0x2b   :  { %758 = vmatpush.bf16.msra.mxu2 %v1344_v57  ;;  %v1712_v20 = vld [vmem:[#allocation5 + $0x104] sm:$0xf0]  ;;  %v1383_v23 = vld [vmem:[#allocation5 + $0x180] sm:$0xf]  ;;  %v103_v25 = vld [vmem:[#allocation2 + $0x8] sm:$0xff]  ;;  %v1264_v26 = vor.u32 %v1698_v15, %v1263_v14  ;;  %vm724_vm0 = vcmask 130048  }
  0x2c   :  { %771 = vmatpush.bf16.msra.mxu3 %v1408_v58  ;;  %v1728_v24 = vld [vmem:[#allocation5 + $0x184] sm:$0xf0]  ;;  %v1503_v27 = vld [vmem:[#allocation5 + $0x270] sm:$0xf]  ;;  %v1758_v28 = vld [vmem:[#allocation5 + $0x274] sm:$0xf0]  ;;  %v216_v35 = vunpack.c.l.b16 %v103_v25  ;;  %v1320_v38 = vor.u32 %v1712_v20, %v1319_v19  ;;  %v217_v53 = vunpack.c.h.b16 %v103_v25 }
  0x2d   :  { %745 = vmatpush.bf16.msra.mxu1 %v1280_v62  ;;  %v1693_v29 = vld [vmem:[#allocation5 + $0x74] sm:$0xf]  ;;  %v1249_v30 = vld [vmem:[#allocation5 + $0x78] sm:$0xf0]  ;;  %v1255_v31 = vld [vmem:[#allocation5 + $0x80] sm:$0xf]  ;;  %v1384_v39 = vor.u32 %v1728_v24, %v1383_v23  ;;  %v1504_v43 = vor.u32 %v1758_v28, %v1503_v27 }
  0x2e   :  { %733 = vmatpush.bf16.msra.mxu0 %v1208_v4  ;;  %v102_v32 = vld [vmem:[#allocation2] sm:$0xff]  ;;  %v1575_v36 = vld [vmem:[#allocation5 + $0x300] sm:$0xf]  ;;  %v1567_v40 = vld [vmem:[#allocation5 + $0x2f0] sm:$0xf]  ;;  %v1252_v44 = vor.u32 %v1693_v29, %v1249_v30  ;;  %v2034_v55 = vpack.c.b16 %v216_v35, %v216_v35  ;;  %v2038_v2 = vpack.c.b16 %v217_v53, %v217_v53 }
  0x2f   :  { %759 = vmatpush.bf16.msra.mxu2 %v1336_v5  ;;  %v1696_v34 = vld [vmem:[#allocation5 + $0x84] sm:$0xf0]  ;;  %v1774_v41 = vld [vmem:[#allocation5 + $0x2f4] sm:$0xf0]  ;;  %v214_v42 = vunpack.c.l.b16 %v102_v32  ;;  %v1709_v45 = vld [vmem:[#allocation5 + $0xf4] sm:$0xf]  ;;  %v215_v54 = vunpack.c.h.b16 %v102_v32 }
  0x30   :  { %772 = vmatpush.bf16.msra.mxu3 %v1400_v6  ;;  %v1776_v37 = vld [vmem:[#allocation5 + $0x304] sm:$0xf0]  ;;  %v1313_v46 = vld [vmem:[#allocation5 + $0xf8] sm:$0xf0]  ;;  %v1495_v47 = vld [vmem:[#allocation5 + $0x260] sm:$0xf]  ;;  %v1256_v48 = vor.u32 %v1696_v34, %v1255_v31  ;;  %v1568_v56 = vor.u32 %v1774_v41, %v1567_v40 }
  0x31   :  { %746 = vmatpush.bf16.msra.mxu1 %v1272_v10  ;;  %v1576_v49 = vor.u32 %v1776_v37, %v1575_v36  ;;  %v1756_v50 = vld [vmem:[#allocation5 + $0x264] sm:$0xf0]  ;;  %v1691_v51 = vld [vmem:[#allocation5 + $0x64] sm:$0xf]  ;;  %v1241_v52 = vld [vmem:[#allocation5 + $0x68] sm:$0xf0]  ;;  %v1316_v57 = vor.u32 %v1709_v45, %v1313_v46  ;;  %v2036_v58 = vpack.c.b16 %v214_v42, %v214_v42  ;;  %v2040_v3 = vpack.c.b16 %v215_v54, %v215_v54 }
  0x32   :  { %734 = vmatpush.bf16.msra.mxu0 %v1200_v17  ;;  %v1559_v59 = vld [vmem:[#allocation5 + $0x2e0] sm:$0xf]  ;;  %v1772_v60 = vld [vmem:[#allocation5 + $0x2e4] sm:$0xf0]  ;;  %v1496_v61 = vor.u32 %v1756_v50, %v1495_v47  ;;  %v1244_v62 = vor.u32 %v1691_v51, %v1241_v52  ;;  %v1707_v63 = vld [vmem:[#allocation5 + $0xe4] sm:$0xf] }
  0x33   :  { %760 = vmatpush.bf16.msra.mxu2 %v1328_v21  ;;  %v1305_v0 = vld [vmem:[#allocation5 + $0xe8] sm:$0xf0]  ;;  %v1487_v1 = vld [vmem:[#allocation5 + $0x250] sm:$0xf]  ;;  %v1754_v4 = vld [vmem:[#allocation5 + $0x254] sm:$0xf0]  ;;  %v1560_v7 = vor.u32 %v1772_v60, %v1559_v59 }
  0x34   :  { %773 = vmatpush.bf16.msra.mxu3 %v1392_v22  ;;  %v1689_v5 = vld [vmem:[#allocation5 + $0x54] sm:$0xf]  ;;  %v1233_v6 = vld [vmem:[#allocation5 + $0x58] sm:$0xf0]  ;;  %v1308_v8 = vor.u32 %v1707_v63, %v1305_v0  ;;  %v1551_v9 = vld [vmem:[#allocation5 + $0x2d0] sm:$0xf]  ;;  %v1488_v11 = vor.u32 %v1754_v4, %v1487_v1 }
  0x35   :  { %747 = vmatpush.bf16.msra.mxu1 %v1264_v26  ;;  %v1770_v10 = vld [vmem:[#allocation5 + $0x2d4] sm:$0xf0]  ;;  %v1236_v12 = vor.u32 %v1689_v5, %v1233_v6  ;;  %v1705_v13 = vld [vmem:[#allocation5 + $0xd4] sm:$0xf]  ;;  %v1297_v14 = vld [vmem:[#allocation5 + $0xd8] sm:$0xf0] }
  0x36   :  { %735 = vmatpush.bf16.msra.mxu0 %v1192_v33  ;;  %v1479_v15 = vld [vmem:[#allocation5 + $0x240] sm:$0xf]  ;;  %v1752_v16 = vld [vmem:[#allocation5 + $0x244] sm:$0xf0]  ;;  %v1687_v17 = vld [vmem:[#allocation5 + $0x44] sm:$0xf]  ;;  %v1552_v19 = vor.u32 %v1770_v10, %v1551_v9  ;;  %v1300_v20 = vor.u32 %v1705_v13, %v1297_v14 }
  0x37   :  { %761 = vmatpush.bf16.msra.mxu2 %v1320_v38  ;;  %v1225_v18 = vld [vmem:[#allocation5 + $0x48] sm:$0xf0]  ;;  %v1543_v21 = vld [vmem:[#allocation5 + $0x2c0] sm:$0xf]  ;;  %v1768_v22 = vld [vmem:[#allocation5 + $0x2c4] sm:$0xf0]  ;;  %v1480_v24 = vor.u32 %v1752_v16, %v1479_v15 }
  0x38   :  { %774 = vmatpush.bf16.msra.mxu3 %v1384_v39  ;;  %v105_v23 = vld [vmem:[#allocation2 + $0x18] sm:$0xf]  ;;  %v1228_v25 = vor.u32 %v1687_v17, %v1225_v18  ;;  %v1703_v26 = vld [vmem:[#allocation5 + $0xc4] sm:$0xf]  ;;  %v1289_v27 = vld [vmem:[#allocation5 + $0xc8] sm:$0xf0]  ;;  %v1544_v32 = vor.u32 %v1768_v22, %v1543_v21 }
  0x39   :  { %748 = vmatpush.bf16.msra.mxu1 %v1256_v48  ;;  %736 = vmatmul.bf16.vlgmr.msra.gmra.mxu0 %v2036_v58  ;;  %v1471_v28 = vld [vmem:[#allocation5 + $0x230] sm:$0xf]  ;;  %v1750_v29 = vld [vmem:[#allocation5 + $0x234] sm:$0xf0]  ;;  %v1685_v30 = vld [vmem:[#allocation5 + $0x34] sm:$0xf]  ;;  %v220_v33 = vunpack.c.l.b16 %v105_v23  ;;  %v1292_v34 = vor.u32 %v1703_v26, %v1289_v27 }
  0x3a   :  { %780 = vmatpush.bf16.msrb.mxu0 %v1504_v43  ;;  %762 = vmatmul.bf16.vlgmr.msra.gmra.mxu2 %v2034_v55  ;;  %v1217_v31 = vld [vmem:[#allocation5 + $0x38] sm:$0xf0]  ;;  %v1535_v35 = vld [vmem:[#allocation5 + $0x2b0] sm:$0xf]  ;;  %v1766_v36 = vld [vmem:[#allocation5 + $0x2b4] sm:$0xf0]  ;;  %v1472_v37 = vor.u32 %v1750_v29, %v1471_v28 }
  0x3b   :  { %813 = vmatpush.bf16.msrb.mxu2 %v1576_v49  ;;  %775 = vmatmul.bf16.vlgmr.msra.gmra.mxu3 %v2038_v2  ;;  %v1220_v38 = vor.u32 %v1685_v30, %v1217_v31  ;;  %v1701_v39 = vld [vmem:[#allocation5 + $0xb4] sm:$0xf]  ;;  %v1281_v40 = vld [vmem:[#allocation5 + $0xb8] sm:$0xf0]  ;;  %v1463_v41 = vld [vmem:[#allocation5 + $0x220] sm:$0xf]  ;;  %v1536_v45 = vor.u32 %v1766_v36, %v1535_v35  ;;  %v2046_v46 = vpack.c.b16 %v220_v33, %v220_v33 }
  0x3c   :  { %819 = vmatpush.bf16.msrb.mxu3 %v1252_v44  ;;  %749 = vmatmul.bf16.vlgmr.msra.gmra.mxu1 %v2040_v3  ;;  %v1748_v42 = vld [vmem:[#allocation5 + $0x224] sm:$0xf0]  ;;  %v1683_v43 = vld [vmem:[#allocation5 + $0x24] sm:$0xf]  ;;  %v1209_v44 = vld [vmem:[#allocation5 + $0x28] sm:$0xf0]  ;;  %v1284_v47 = vor.u32 %v1701_v39, %v1281_v40 }
  0x3d   :  { %793 = vmatpush.bf16.msrb.mxu1 %v1568_v56  ;;  %v1527_v48 = vld [vmem:[#allocation5 + $0x2a0] sm:$0xf]  ;;  %v1764_v49 = vld [vmem:[#allocation5 + $0x2a4] sm:$0xf0]  ;;  %v1464_v50 = vor.u32 %v1748_v42, %v1463_v41  ;;  %v1212_v51 = vor.u32 %v1683_v43, %v1209_v44  ;;  %v1699_v52 = vld [vmem:[#allocation5 + $0xa4] sm:$0xf] }
  0x3e   :  { %781 = vmatpush.bf16.msrb.mxu0 %v1496_v61  ;;  %v1273_v53 = vld [vmem:[#allocation5 + $0xa8] sm:$0xf0]  ;;  %v1455_v54 = vld [vmem:[#allocation5 + $0x210] sm:$0xf]  ;;  %v1746_v56 = vld [vmem:[#allocation5 + $0x214] sm:$0xf0]  ;;  %v1528_v60 = vor.u32 %v1764_v49, %v1527_v48 }
  0x3f   :  { %832 = vmatpush.bf16.msra.mxu2 %v1316_v57  ;;  %v1681_v57 = vld [vmem:[#allocation5 + $0x14] sm:$0xf]  ;;  %v1201_v59 = vld [vmem:[#allocation5 + $0x18] sm:$0xf0]  ;;  %v1519_v61 = vld [vmem:[#allocation5 + $0x290] sm:$0xf]  ;;  %v1456_v4 = vor.u32 %v1746_v56, %v1455_v54 }
  0x40   :  { %820 = vmatpush.bf16.msrb.mxu3 %v1244_v62  ;;  %v1276_v62 = vor.u32 %v1699_v52, %v1273_v53  ;;  %v1762_v63 = vld [vmem:[#allocation5 + $0x294] sm:$0xf0]  ;;  %v1697_v0 = vld [vmem:[#allocation5 + $0x94] sm:$0xf]  ;;  %v1265_v1 = vld [vmem:[#allocation5 + $0x98] sm:$0xf0]  ;;  %v1204_v5 = vor.u32 %v1681_v57, %v1201_v59 }
  0x41   :  { %794 = vmatpush.bf16.msrb.mxu1 %v1560_v7  ;;  %v1447_v6 = vld [vmem:[#allocation5 + $0x200] sm:$0xf]  ;;  %v1744_v7 = vld [vmem:[#allocation5 + $0x204] sm:$0xf0]  ;;  %v1679_v9 = vld [vmem:[#allocation5 + $0x4] sm:$0xf]  ;;  %v1268_v16 = vor.u32 %v1697_v0, %v1265_v1 }
  0x42   :  { %782 = vmatpush.bf16.msrb.mxu0 %v1488_v11  ;;  %v1193_v10 = vld [vmem:[#allocation5 + $0x8] sm:$0xf0]  ;;  %v1725_v11 = vld [vmem:[#allocation5 + $0x174] sm:$0xf]  ;;  %v1377_v13 = vld [vmem:[#allocation5 + $0x178] sm:$0xf0] }
  0x43   :  { %833 = vmatpush.bf16.msra.mxu2 %v1308_v8  ;;  %v104_v8 = vld [vmem:[#allocation2 + $0x10] sm:$0xff]  ;;  %v1505_v15 = vld [vmem:[#allocation5 + $0x278] sm:$0xf0]  ;;  %v1511_v17 = vld [vmem:[#allocation5 + $0x280] sm:$0xf]  ;;  %v1196_v21 = vor.u32 %v1679_v9, %v1193_v10 }
  0x44   :  { %821 = vmatpush.bf16.msrb.mxu3 %v1236_v12  ;;  %v1520_v12 = vor.u32 %v1762_v63, %v1519_v61  ;;  %v1757_v14 = vld [vmem:[#allocation5 + $0x274] sm:$0xf]  ;;  %v1760_v18 = vld [vmem:[#allocation5 + $0x284] sm:$0xf0]  ;;  %v1695_v22 = vld [vmem:[#allocation5 + $0x84] sm:$0xf]  ;;  %v219_v30 = vunpack.c.h.b16 %v104_v8 }
  0x45   :  { %795 = vmatpush.bf16.msrb.mxu1 %v1552_v19  ;;  %v218_v19 = vunpack.c.l.b16 %v104_v8  ;;  %v1257_v23 = vld [vmem:[#allocation5 + $0x88] sm:$0xf0]  ;;  %v1508_v26 = vor.u32 %v1757_v14, %v1505_v15  ;;  %v1441_v27 = vld [vmem:[#allocation5 + $0x1f8] sm:$0xf0]  ;;  %v1773_v28 = vld [vmem:[#allocation5 + $0x2f4] sm:$0xf]  ;;  %v1512_v31 = vor.u32 %v1760_v18, %v1511_v17 }
  0x46   :  { %783 = vmatpush.bf16.msrb.mxu0 %v1480_v24  ;;  %v1741_v24 = vld [vmem:[#allocation5 + $0x1f4] sm:$0xf]  ;;  %v1569_v29 = vld [vmem:[#allocation5 + $0x2f8] sm:$0xf0]  ;;  %v1369_v33 = vld [vmem:[#allocation5 + $0x168] sm:$0xf0]  ;;  %v1260_v35 = vor.u32 %v1695_v22, %v1257_v23  ;;  %v2052_v41 = vpack.c.b16 %v219_v30, %v219_v30 }
  0x47   :  { %834 = vmatpush.bf16.msra.mxu2 %v1300_v20  ;;  %v1448_v20 = vor.u32 %v1744_v7, %v1447_v6  ;;  %v1755_v36 = vld [vmem:[#allocation5 + $0x264] sm:$0xf]  ;;  %v1572_v39 = vor.u32 %v1773_v28, %v1569_v29  ;;  %v1433_v43 = vld [vmem:[#allocation5 + $0x1e8] sm:$0xf0]  ;;  %v1721_v48 = vld [vmem:[#allocation5 + $0x154] sm:$0xf] }
  0x48   :  { %822 = vmatpush.bf16.msrb.mxu3 %v1228_v25  ;;  %v1380_v25 = vor.u32 %v1725_v11, %v1377_v13  ;;  %v1739_v40 = vld [vmem:[#allocation5 + $0x1e4] sm:$0xf]  ;;  %v1361_v49 = vld [vmem:[#allocation5 + $0x158] sm:$0xf0]  ;;  %v1737_v54 = vld [vmem:[#allocation5 + $0x1d4] sm:$0xf] }
  0x49   :  { %796 = vmatpush.bf16.msrb.mxu1 %v1544_v32  ;;  %v1723_v32 = vld [vmem:[#allocation5 + $0x164] sm:$0xf]  ;;  %v1436_v52 = vor.u32 %v1739_v40, %v1433_v43  ;;  %v1425_v56 = vld [vmem:[#allocation5 + $0x1d8] sm:$0xf0]  ;;  %v1364_v57 = vor.u32 %v1721_v48, %v1361_v49  ;;  %v1769_v59 = vld [vmem:[#allocation5 + $0x2d4] sm:$0xf] }
  0x4a   :  { %784 = vmatpush.bf16.msrb.mxu0 %v1472_v37  ;;  %1581 = vmatmul.msk.bf16.vlgmr.msrb.gmra.mxu2 %vm724_vm0, %v2046_v46  ;;  %v1497_v37 = vld [vmem:[#allocation5 + $0x268] sm:$0xf0]  ;;  %v1372_v42 = vor.u32 %v1723_v32, %v1369_v33  ;;  %v1771_v44 = vld [vmem:[#allocation5 + $0x2e4] sm:$0xf]  ;;  %v1749_v13 = vld [vmem:[#allocation5 + $0x234] sm:$0xf] }
  0x4b   :  { %835 = vmatpush.bf16.msra.mxu2 %v1292_v34  ;;  %v2050_v34 = vpack.c.b16 %v218_v19, %v218_v19  ;;  %v1353_v63 = vld [vmem:[#allocation5 + $0x148] sm:$0xf0]  ;;  %v1751_v0 = vld [vmem:[#allocation5 + $0x244] sm:$0xf]  ;;  %v1473_v14 = vld [vmem:[#allocation5 + $0x238] sm:$0xf0] }
  0x4c   :  { %823 = vmatpush.bf16.msrb.mxu3 %v1220_v38  ;;  %v1444_v38 = vor.u32 %v1741_v24, %v1441_v27  ;;  %v1481_v1 = vld [vmem:[#allocation5 + $0x248] sm:$0xf0]  ;;  %v1735_v6 = vld [vmem:[#allocation5 + $0x1c4] sm:$0xf]  ;;  %v1409_v18 = vld [vmem:[#allocation5 + $0x1b8] sm:$0xf0] }
  0x4d   :  { %797 = vmatpush.bf16.msrb.mxu1 %v1536_v45  ;;  %v1561_v45 = vld [vmem:[#allocation5 + $0x2e8] sm:$0xf0]  ;;  %v1767_v9 = vld [vmem:[#allocation5 + $0x2c4] sm:$0xf]  ;;  %v1484_v11 = vor.u32 %v1751_v0, %v1481_v1  ;;  %v1765_v19 = vld [vmem:[#allocation5 + $0x2b4] sm:$0xf] }
  0x4e   :  { %785 = vmatpush.bf16.msrb.mxu0 %v1464_v50  ;;  %v1753_v50 = vld [vmem:[#allocation5 + $0x254] sm:$0xf]  ;;  %v1564_v53 = vor.u32 %v1771_v44, %v1561_v45  ;;  %v1417_v8 = vld [vmem:[#allocation5 + $0x1c8] sm:$0xf0]  ;;  %v1715_v22 = vld [vmem:[#allocation5 + $0x124] sm:$0xf] }
  0x4f   :  { %836 = vmatpush.bf16.msra.mxu2 %v1284_v47  ;;  %v1500_v47 = vor.u32 %v1755_v36, %v1497_v37  ;;  %v1545_v10 = vld [vmem:[#allocation5 + $0x2c8] sm:$0xf0]  ;;  %v1420_v15 = vor.u32 %v1735_v6, %v1417_v8  ;;  %v1747_v24 = vld [vmem:[#allocation5 + $0x224] sm:$0xf]  ;;  %v1329_v36 = vld [vmem:[#allocation5 + $0x118] sm:$0xf0] }
  0x50   :  { %824 = vmatpush.bf16.msrb.mxu3 %v1212_v51  ;;  %v1489_v51 = vld [vmem:[#allocation5 + $0x258] sm:$0xf0]  ;;  %v1337_v23 = vld [vmem:[#allocation5 + $0x128] sm:$0xf0]  ;;  %v1731_v28 = vld [vmem:[#allocation5 + $0x1a4] sm:$0xf] }
  0x51   :  { %798 = vmatpush.bf16.msrb.mxu1 %v1528_v60  ;;  %v1553_v60 = vld [vmem:[#allocation5 + $0x2d8] sm:$0xf0]  ;;  %v1492_v61 = vor.u32 %v1753_v50, %v1489_v51  ;;  %v1340_v29 = vor.u32 %v1715_v22, %v1337_v23  ;;  %v1401_v30 = vld [vmem:[#allocation5 + $0x1a8] sm:$0xf0]  ;;  %v1745_v37 = vld [vmem:[#allocation5 + $0x214] sm:$0xf] }
  0x52   :  { %786 = vmatpush.bf16.msrb.mxu0 %v1456_v4  ;;  %v1428_v4 = vor.u32 %v1737_v54, %v1425_v56  ;;  %v1529_v32 = vld [vmem:[#allocation5 + $0x2a8] sm:$0xf0]  ;;  %v1393_v44 = vld [vmem:[#allocation5 + $0x198] sm:$0xf0]  ;;  %v1761_v45 = vld [vmem:[#allocation5 + $0x294] sm:$0xf] }
  0x53   :  { %837 = vmatpush.bf16.msra.mxu2 %v1276_v62  ;;  %v1719_v62 = vld [vmem:[#allocation5 + $0x144] sm:$0xf]  ;;  %v1321_v50 = vld [vmem:[#allocation5 + $0x108] sm:$0xf0]  ;;  %v1782_v8 = vld [vmem:[#allocation8 + $0x28] sm:$0xff] }
  0x54   :  { %825 = vmatpush.bf16.msrb.mxu3 %v1204_v5  ;;  %v1556_v5 = vor.u32 %v1769_v59, %v1553_v60  ;;  %v1356_v7 = vor.u32 %v1719_v62, %v1353_v63  ;;  %v1711_v49 = vld [vmem:[#allocation5 + $0x104] sm:$0xf]  ;;  %v1385_v59 = vld [vmem:[#allocation5 + $0x188] sm:$0xf0] }
  0x55   :  { %799 = vmatpush.bf16.msrb.mxu1 %v1520_v12  ;;  %v1717_v12 = vld [vmem:[#allocation5 + $0x134] sm:$0xf]  ;;  %v1743_v51 = vld [vmem:[#allocation5 + $0x204] sm:$0xf]  ;;  %v1324_v56 = vor.u32 %v1711_v49, %v1321_v50  ;;  %v1513_v62 = vld [vmem:[#allocation5 + $0x288] sm:$0xf0] }
  0x56   :  { %787 = vmatpush.bf16.msrb.mxu0 %v1448_v20  ;;  %v1537_v20 = vld [vmem:[#allocation5 + $0x2b8] sm:$0xf0]  ;;  %v1775_v63 = vld [vmem:[#allocation5 + $0x304] sm:$0xf]  ;;  %v1577_v0 = vld [vmem:[#allocation5 + $0x308] sm:$0xf0] }
  0x57   :  { %838 = vmatpush.bf16.msra.mxu2 %v1268_v16  ;;  %v1733_v16 = vld [vmem:[#allocation5 + $0x1b4] sm:$0xf]  ;;  %v1540_v27 = vor.u32 %v1765_v19, %v1537_v20  ;;  %v1784_v6 = vld [vmem:[#allocation8 + $0x38] sm:$0xff] }
  0x58   :  { %826 = vmatpush.bf16.msrb.mxu3 %v1196_v21  ;;  %v1476_v21 = vor.u32 %v1749_v13, %v1473_v14 }
  0x59   :  { %800 = vmatpush.bf16.msrb.mxu1 %v1512_v31  ;;  %788 = vmatmul.bf16.vlgmr.msrb.gmra.mxu0 %v2050_v34  ;;  %v1763_v31 = vld [vmem:[#allocation5 + $0x2a4] sm:$0xf] }
  0x5a   :  { %845 = vmatpush.bf16.msra.mxu0 %v1380_v25  ;;  %v1465_v25 = vld [vmem:[#allocation5 + $0x228] sm:$0xf0]  ;;  %v1532_v40 = vor.u32 %v1763_v31, %v1529_v32 }
  0x5b   :  { %839 = vmatpush.bf16.msra.mxu2 %v1260_v35  ;;  %827 = vmatmul.bf16.vlgmr.msrb.gmra.mxu3 %v2036_v58  ;;  %v1548_v58 = vor.u32 %v1767_v9, %v1545_v10  ;;  %v1468_v33 = vor.u32 %v1747_v24, %v1465_v25  ;;  %v1713_v35 = vld [vmem:[#allocation5 + $0x114] sm:$0xf]  ;;  %v1778_v10 = vld [vmem:[#allocation8 + $0x8] sm:$0xff] }
  0x5c   :  { %871 = vmatpush.bf16.msra.mxu3 %v1508_v26  ;;  %801 = vmatmul.bf16.vlgmr.msrb.gmra.mxu1 %v2052_v41  ;;  %v1412_v26 = vor.u32 %v1733_v16, %v1409_v18  ;;  %v1332_v43 = vor.u32 %v1713_v35, %v1329_v36  ;;  %v1781_v9 = vld [vmem:[#allocation8 + $0x20] sm:$0xff] }
  0x5d   :  { %858 = vmatpush.bf16.msra.mxu1 %v1444_v38  ;;  %v1457_v38 = vld [vmem:[#allocation5 + $0x218] sm:$0xf0] }
  0x5e   :  { %846 = vmatpush.bf16.msra.mxu0 %v1372_v42  ;;  %840 = vmatmul.bf16.vlgmr.msra.gmra.mxu2 %v2040_v3  ;;  %v1345_v3 = vld [vmem:[#allocation5 + $0x138] sm:$0xf0]  ;;  %v1729_v42 = vld [vmem:[#allocation5 + $0x194] sm:$0xf]  ;;  %v1460_v48 = vor.u32 %v1745_v37, %v1457_v38 }
  0x5f   :  { %884 = vmatpush.bf16.msrb.mxu2 %v1572_v39  ;;  %v1348_v17 = vor.u32 %v1717_v12, %v1345_v3  ;;  %v1404_v39 = vor.u32 %v1731_v28, %v1401_v30  ;;  %v1790_v30 = vld [vmem:[#allocation8 + $0x68] sm:$0xff] }
  0x60   :  { %872 = vmatpush.bf16.msra.mxu3 %v1500_v47  ;;  %v1521_v47 = vld [vmem:[#allocation5 + $0x298] sm:$0xf0] }
  0x61   :  { %859 = vmatpush.bf16.msra.mxu1 %v1436_v52  ;;  %v1449_v52 = vld [vmem:[#allocation5 + $0x208] sm:$0xf0]  ;;  %v1524_v54 = vor.u32 %v1761_v45, %v1521_v47  ;;  %v1785_v45 = vld [vmem:[#allocation8 + $0x40] sm:$0xff] }
  0x62   :  { %847 = vmatpush.bf16.msra.mxu0 %v1364_v57  ;;  %v1727_v57 = vld [vmem:[#allocation5 + $0x184] sm:$0xf]  ;;  %v1452_v60 = vor.u32 %v1743_v51, %v1449_v52 }
  0x63   :  { %885 = vmatpush.bf16.msrb.mxu2 %v1564_v53  ;;  %v1396_v53 = vor.u32 %v1729_v42, %v1393_v44  ;;  %v1388_v1 = vor.u32 %v1727_v57, %v1385_v59  ;;  %v1786_v44 = vld [vmem:[#allocation8 + $0x48] sm:$0xff] }
  0x64   :  { %873 = vmatpush.bf16.msra.mxu3 %v1492_v61  ;;  %v1759_v61 = vld [vmem:[#allocation5 + $0x284] sm:$0xf] }
  0x65   :  { %860 = vmatpush.bf16.msra.mxu1 %v1428_v4  ;;  %v1516_v4 = vor.u32 %v1759_v61, %v1513_v62 }
  0x66   :  { %848 = vmatpush.bf16.msra.mxu0 %v1356_v7  ;;  %v1783_v7 = vld [vmem:[#allocation8 + $0x30] sm:$0xff] }
  0x67   :  { %886 = vmatpush.bf16.msrb.mxu2 %v1556_v5  ;;  %v1580_v5 = vor.u32 %v1775_v63, %v1577_v0 }
  0x68   :  { %874 = vmatpush.bf16.msra.mxu3 %v1484_v11 }
  0x69   :  { %861 = vmatpush.bf16.msra.mxu1 %v1420_v15 }
  0x6a   :  { %849 = vmatpush.bf16.msra.mxu0 %v1348_v17 }
  0x6b   :  { %887 = vmatpush.bf16.msrb.mxu2 %v1548_v58 }
  0x6c   :  { %875 = vmatpush.bf16.msra.mxu3 %v1476_v21  ;;  %v1792_v21 = vld [vmem:[#allocation8 + $0x78] sm:$0xff] }
  0x6d   :  { %862 = vmatpush.bf16.msra.mxu1 %v1412_v26  ;;  %v1791_v26 = vld [vmem:[#allocation8 + $0x70] sm:$0xff] }
  0x6e   :  { %850 = vmatpush.bf16.msra.mxu0 %v1340_v29 }
  0x6f   :  { %888 = vmatpush.bf16.msrb.mxu2 %v1540_v27 }
  0x70   :  { %876 = vmatpush.bf16.msra.mxu3 %v1468_v33  ;;  %v1789_v33 = vld [vmem:[#allocation8 + $0x60] sm:$0xff] }
  0x71   :  { %863 = vmatpush.bf16.msra.mxu1 %v1404_v39  ;;  %v1788_v39 = vld [vmem:[#allocation8 + $0x58] sm:$0xff] }
  0x72   :  { %851 = vmatpush.bf16.msra.mxu0 %v1332_v43 }
  0x73   :  { %889 = vmatpush.bf16.msrb.mxu2 %v1532_v40  ;;  %v1787_v40 = vld [vmem:[#allocation8 + $0x50] sm:$0xff] }
  0x74   :  { %877 = vmatpush.bf16.msra.mxu3 %v1460_v48 }
  0x75   :  { %864 = vmatpush.bf16.msra.mxu1 %v1396_v53 }
  0x76   :  { %852 = vmatpush.bf16.msra.mxu0 %v1324_v56 }
  0x77   :  { %890 = vmatpush.bf16.msrb.mxu2 %v1524_v54 }
  0x78   :  { %878 = vmatpush.bf16.msra.mxu3 %v1452_v60 }
  0x79   :  { %865 = vmatpush.bf16.msra.mxu1 %v1388_v1  ;;  %853 = vmatmul.bf16.vlgmr.msra.gmra.mxu0 %v2034_v55  ;;  %v1780_v55 = vld [vmem:[#allocation8 + $0x18] sm:$0xff] }
  0x7b   :  { %879 = vmatmul.bf16.vlgmr.msra.gmra.mxu3 %v2050_v34  ;;  %891 = vmatpush.bf16.msrb.mxu2 %v1516_v4  ;;  %v1779_v34 = vld [vmem:[#allocation8 + $0x10] sm:$0xff] }
  0x7c   :  { %866 = vmatmul.bf16.vlgmr.msra.gmra.mxu1 %v2038_v2  ;;  %1059 = vmatpush.bf16.msrb.mxu3 %v1792_v21 }
  0x7d   :  { %1046 = vmatpush.bf16.msrb.mxu1 %v1784_v6 }
  0x7e   :  { %892 = vmatmul.bf16.vlgmr.msrb.gmra.mxu2 %v2052_v41  ;;  %v1777_v41 = vld [vmem:[#allocation8] sm:$0xff] }
  0x7f   :  { %904 = vmatpush.bf16.msra.mxu2 %v1580_v5 }
  0x80   :  { %1060 = vmatpush.bf16.msrb.mxu3 %v1791_v26 }
  0x81   :  { %1047 = vmatpush.bf16.msrb.mxu1 %v1783_v7  ;;  %v1800_v7 = vld [vmem:[#allocation10 + $0x38] sm:$0xff] }
  0x82   :  { %1142 = vmatpush.bf16.msrb.mxu0 %v1800_v7 }
  0x84   :  { %1061 = vmatpush.bf16.msrb.mxu3 %v1790_v30 }
  0x85   :  { %1048 = vmatpush.bf16.msrb.mxu1 %v1782_v8  ;;  %v1799_v8 = vld [vmem:[#allocation10 + $0x30] sm:$0xff] }
  0x86   :  { %1143 = vmatpush.bf16.msrb.mxu0 %v1799_v8 }
  0x88   :  { %1062 = vmatpush.bf16.msrb.mxu3 %v1789_v33 }
  0x89   :  { %1049 = vmatpush.bf16.msrb.mxu1 %v1781_v9  ;;  %v1798_v9 = vld [vmem:[#allocation10 + $0x28] sm:$0xff] }
  0x8a   :  { %1144 = vmatpush.bf16.msrb.mxu0 %v1798_v9 }
  0x8c   :  { %1063 = vmatpush.bf16.msrb.mxu3 %v1788_v39 }
  0x8d   :  { %1050 = vmatpush.bf16.msrb.mxu1 %v1780_v55  ;;  %v1797_v55 = vld [vmem:[#allocation10 + $0x20] sm:$0xff] }
  0x8e   :  { %1582 = vmatmul.msk.bf16.vlgmr.msra.gmra.mxu2 %vm724_vm0, %v2046_v46  ;;  %v204_v46 = vld [vmem:[#allocation7] sm:$0x3]  ;;  %1145 = vmatpush.bf16.msrb.mxu0 %v1797_v55 }
  0x8f   :  { %v206_v15 = vperm.slane %v204_v46, 0  ;;  %v207_v49 = vperm.slane %v204_v46, 1  ;;  %v1811_v46 = vld [vmem:[%s2077_s4] ss:$0 sm:$0xff]  ;;  %s1978_s4 = smov [#allocation11]  }
  0x90   :  { %1064 = vmatpush.bf16.msrb.mxu3 %v1787_v40  ;;  %s1175_s29 = sshll.u32 %s1978_s4, 4  ;;  %s1176_s29 = int_to_ptr.vmem [resolvable:$true] %s1175_s29 }
  0x91   :  { %1051 = vmatpush.bf16.msrb.mxu1 %v1779_v34  ;;  %v1796_v34 = vld [vmem:[#allocation10 + $0x18] sm:$0xff] }
  0x92   :  { %1146 = vmatpush.bf16.msrb.mxu0 %v1796_v34 }
  0x94   :  { %1065 = vmatpush.bf16.msrb.mxu3 %v1786_v44 }
  0x95   :  { %1052 = vmatpush.bf16.msrb.mxu1 %v1778_v10  ;;  %v1795_v10 = vld [vmem:[#allocation10 + $0x10] sm:$0xff] }
  0x96   :  { %1147 = vmatpush.bf16.msrb.mxu0 %v1795_v10 }
  0x98   :  { %1066 = vmatpush.bf16.msrb.mxu3 %v1785_v45 }
  0x99   :  { %1053 = vmatpush.bf16.msrb.mxu1 %v1777_v41  ;;  %v1794_v41 = vld [vmem:[#allocation10 + $0x8] sm:$0xff] }
  0x9a   :  { %1148 = vmatpush.bf16.msrb.mxu0 %v1794_v41 }
  0xb6   :  { %v737_v11 = vpop.f32.mrf.mxu0 }
  0xb7   :  { %v738_v16 = vadd.f32 %v737_v11, %v206_v15 }
  0xb9   :  { %v750_v2 = vpop.f32.mrf.mxu1 }
  0xba   :  { %v751_v18 = vadd.f32 %v750_v2, %v738_v16 }
  0xbd   :  { %v763_v12 = vpop.f32.mrf.mxu2 }
  0xbe   :  { %v776_v3 = vpop.f32.mrf.mxu3  ;;  %v739_v13 = vpop.f32.mrf.mxu0  ;;  %v764_v20 = vadd.f32 %v763_v12, %v751_v18  ;;  %v1793_v12 = vld [vmem:[#allocation10] sm:$0xff] }
  0xbf   :  { %1149 = vmatpush.bf16.msrb.mxu0 %v1793_v12 }
  0xc0   :  { %v777_v22 = vadd.f32 %v776_v3, %v764_v20 }
  0xc1   :  { %v752_v14 = vpop.f32.mrf.mxu1 }
  0xc5   :  { %v765_v58 = vpop.f32.mrf.mxu2 }
  0xc6   :  { %v778_v17 = vpop.f32.mrf.mxu3 }
  0xc7   :  { %v1155_v17 = vlaneseq }
  0xc9   :  { %v1156_v18 = vand.u32 127, %v1155_v17 }
  0xcb   :  { %vm1157_vm1 = vcmp.lt.s32.totalorder %v1156_v18, 10 }
  0xcd   :  { %v815_v19 = vpop.f32.mrf.mxu2 }
  0xd5   :  { %v817_v25 = vpop.f32.mrf.mxu2 }
  0xd6   :  { %v789_v23 = vpop.f32.mrf.mxu0 }
  0xd7   :  { %v790_v24 = vadd.f32 %v789_v23, %v777_v22 }
  0xd9   :  { %v802_v27 = vpop.f32.mrf.mxu1 }
  0xda   :  { %v803_v28 = vadd.f32 %v802_v27, %v790_v24 }
  0xdc   :  { %v816_v29 = vadd.f32 %v815_v19, %v803_v28  ;;  %v1812_v19 = vld [vmem:[%s2079_s6] ss:$0 sm:$0xff]  ;;  %s1177_s6 = sshll.u32 %s2080_s7, 4  ;;  %s1178_s6 = int_to_ptr.hbm [resolvable:$true] %s1177_s6 }
  0xde   :  { %v910_v31 = vmax.f32 %v816_v29, 0.0  ;;  %v791_v32 = vpop.f32.mrf.mxu0  ;;  %v828_v37 = vpop.f32.mrf.mxu3 }
  0xdf   :  { %v829_v52 = vadd.f32 %v828_v37, %v207_v49 }
  0xe0   :  { %v912_v35 = vpack.c.bf16 %v910_v31, %v910_v31 }
  0xe1   :  { %v841_v36 = vpop.f32.mrf.mxu2  ;;  %v804_v38 = vpop.f32.mrf.mxu1 }
  0xe2   :  { %1054 = vmatmul.bf16.vlgmr.msrb.gmra.mxu1 %v912_v35  ;;  %v842_v56 = vadd.f32 %v841_v36, %v829_v52 }
  0xe6   :  { %v830_v43 = vpop.f32.mrf.mxu3 }
  0xe9   :  { %v843_v42 = vpop.f32.mrf.mxu2 }
  0xf6   :  { %v854_v47 = vpop.f32.mrf.mxu0 }
  0xf7   :  { %v855_v57 = vadd.f32 %v854_v47, %v842_v56 }
  0xf9   :  { %v867_v48 = vpop.f32.mrf.mxu1 }
  0xfa   :  { %v868_v61 = vadd.f32 %v867_v48, %v855_v57 }
  0xfe   :  { %v880_v50 = vpop.f32.mrf.mxu3  ;;  %v856_v51 = vpop.f32.mrf.mxu0 }
  0xff   :  { %v881_v62 = vadd.f32 %v880_v50, %v868_v61 }
 0x101   :  { %v893_v53 = vpop.f32.mrf.mxu2  ;;  %v869_v54 = vpop.f32.mrf.mxu1 }
 0x102   :  { %v894_v63 = vadd.f32 %v893_v53, %v881_v62 }
 0x106   :  { %v882_v59 = vpop.f32.mrf.mxu3 }
 0x109   :  { %v895_v60 = vpop.f32.mrf.mxu2 }
 0x111   :  { %v906_v0 = vpop.f32.mrf.mxu2 }
 0x112   :  { %v907_v1 = vadd.f32 %v906_v0, %v894_v63 }
 0x114   :  { %v911_v4 = vmax.f32 %v907_v1, 0.0 }
 0x116   :  { %v913_v5 = vpack.c.bf16 %v911_v4, %v911_v4 }
 0x118   :  { %1067 = vmatmul.bf16.vlgmr.msrb.gmra.mxu3 %v913_v5 }
 0x119   :  { %v908_v6 = vpop.f32.mrf.mxu2 }
 0x15f   :  { %v1055_v11 = vpop.f32.mrf.mxu1 }
 0x160   :  { %v1056_v3 = vadd.f32 %v1811_v46, %v1055_v11 }
 0x167   :  { %v1057_v2 = vpop.f32.mrf.mxu1 }
 0x19b   :  { %v1068_v13 = vpop.f32.mrf.mxu3 }
 0x19c   :  { %v1069_v14 = vadd.f32 %v1068_v13, %v1056_v3 }
 0x19e   :  { %v1072_v15 = vmax.f32 %v1069_v14, 0.0 }
 0x1a0   :  { %v1073_v58 = vpack.c.bf16 %v1072_v15, %v1072_v15 }
 0x1a2   :  { %1150 = vmatmul.bf16.vlgmr.msrb.gmra.mxu0 %v1073_v58 }
 0x1a3   :  { %v1070_v16 = vpop.f32.mrf.mxu3 }
 0x21f   :  { %v1151_v20 = vpop.f32.mrf.mxu0 }
 0x220   :  { %v1152_v21 = vadd.f32 %v1812_v19, %v1151_v20 }
 0x222   :  { %v1158_v22 = vsel %vm1157_vm1, %v1152_v21, -1e+30 }
 0x223   :  { %1159 = vmax.xlane.f32.xlu0 %v1158_v22 }
 0x227   :  { %v1153_v23 = vpop.f32.mrf.mxu0 }
 0x296   :  { %v1160_v24 = vpop.xlane.xlu0 %1159 }
 0x297   :  { %v1161_v25 = vsub.f32 %v1158_v22, %v1160_v24 }
 0x299   :  { %v1162_v26 = vmul.f32 1.442695, %v1161_v25 }
 0x29b   :  { %1813 = vpow2.f32 %v1162_v26 }
 0x2a1   :  { %v1814_v27 = vpop.eup %1813 }
 0x2a2   :  { %1164 = vadd.xlane.f32.xlu0 %v1814_v27 }
 0x315   :  { %v1165_v28 = vpop.xlane.xlu0 %1164 }
 0x316   :  { %1815 = vlog2.f32 %v1165_v28 }
 0x31c   :  { %v1816_v29 = vpop.eup %1815 }
 0x31d   :  { %v1167_v30 = vmul.f32 0.6931472, %v1816_v29 }
 0x31f   :  { %v1168_v31 = vsub.f32 %v1161_v25, %v1167_v30 }
 0x321   :  { %1169 = vst [vmem:[#allocation11] sm:$0xff] %v1168_v31 }
 0x322   :  { %1180 = dma.vmem_to_hbm [thread:$0]  %s1176_s29, 128, %s1178_s6, [#allocation4]  }
 0x323   :  { %1967 = dma.done.wait [#allocation4], 128  }
 0x324   :  { %1968 = vsyncadd [#allocation4], 4294967168 }
 0x325   :  { %1185 = vsyncpa [#allocation3], 1 }
 0x326   :  { %1186 = vsyncpa [#allocation6], 1 }
 0x327   :  { %1187 = vsyncpa [#allocation9], 1 }
 0x328   :  { %1188 = vsyncpa [#allocation4], 1 }

</bundles_post_ra>
